<compile_context>
chip_gen: v6e
topology: v6e:2x2x1
jax: 0.10.0
libtpu: 0.0.40
codegen_flags: <defaults>
</compile_context>

<pallas_src>
import functools

import jax
import jax.numpy as jnp
from jax.experimental import pallas as pl
from jax.experimental.pallas import tpu as pltpu


def _round_up(x, m):
    return ((x + m - 1) // m) * m


def _pad2d(x, mp, np_):
    M, N = x.shape
    if M == mp and N == np_:
        return x
    return jnp.pad(x, ((0, mp - M), (0, np_ - N)))


# ----------------------------------------------------------------------------
# Tiled fused linear kernel: y = act(pre_act(x) @ w + b)
#   - bf16 MXU operands, f32 accumulation in VMEM scratch
#   - grid = (M/tm, N/tn, K/tk), accumulator init/finalize via pl.when
# ----------------------------------------------------------------------------
def _linear_kernel(x_ref, w_ref, b_ref, o_ref, acc_ref, *, activation,
                   pre_activation):
    k = pl.program_id(2)

    @pl.when(k == 0)
    def _():
        acc_ref[...] = jnp.zeros_like(acc_ref)

    x = x_ref[...]
    if pre_activation == "tanh":
        x = jnp.tanh(x)          # tanh(0)=0, so zero K-padding stays harmless
    acc_ref[...] += jnp.dot(x.astype(jnp.bfloat16), w_ref[...],
                            preferred_element_type=jnp.float32)

    @pl.when(k == pl.num_programs(2) - 1)
    def _():
        y = acc_ref[...] + b_ref[...]
        if activation == "tanh":
            y = jnp.tanh(y)
        o_ref[...] = y.astype(o_ref.dtype)


def linear_pallas(x, w, b, activation=None, pre_activation=None,
                  tm=256, tn=512, tk=512):
    M, K = x.shape
    K2, N = w.shape
    assert K == K2
    # When no in-kernel pre-activation is needed, feed the MXU bf16 activations
    # directly (halves x-side DMA bytes).  Otherwise keep f32 so the fused tanh
    # runs at full precision inside the kernel.
    x_bf16 = pre_activation is None
    sub = 16 if x_bf16 else 8          # bf16 packs 2 rows per sublane
    # Shrink tiles to the (padded) problem size so tiny layers stay tiny.
    tm = min(tm, _round_up(M, sub))
    tn = min(tn, _round_up(N, 128))
    tk = min(tk, _round_up(K, 128))
    Mp, Kp, Np = _round_up(M, tm), _round_up(K, tk), _round_up(N, tn)

    xp = _pad2d(x.astype(jnp.bfloat16 if x_bf16 else jnp.float32), Mp, Kp)
    wp = _pad2d(w.astype(jnp.bfloat16), Kp, Np)      # halve weight DMA bytes
    bp = _pad2d(b.reshape(1, N).astype(jnp.float32), 1, Np)

    out = pl.pallas_call(
        functools.partial(_linear_kernel, activation=activation,
                          pre_activation=pre_activation),
        grid=(Mp // tm, Np // tn, Kp // tk),
        in_specs=[
            pl.BlockSpec((tm, tk), lambda i, j, k: (i, k)),
            pl.BlockSpec((tk, tn), lambda i, j, k: (k, j)),
            pl.BlockSpec((1, tn), lambda i, j, k: (0, j)),
        ],
        out_specs=pl.BlockSpec((tm, tn), lambda i, j, k: (i, j)),
        out_shape=jax.ShapeDtypeStruct((Mp, Np), jnp.float32),
        scratch_shapes=[pltpu.VMEM((tm, tn), jnp.float32)],
        compiler_params=pltpu.CompilerParams(
            dimension_semantics=("parallel", "parallel", "arbitrary"),
            vmem_limit_bytes=32 * 1024 * 1024),
    )(xp, wp, bp)
    if Mp == M and Np == N:
        return out
    return out[:M, :N]


# ----------------------------------------------------------------------------
# LSTM recurrence kernel: grid over time, h/c state in VMEM scratch.
# The input projection x @ W_ih + b is hoisted (computed with linear_pallas);
# each step only does h @ W_hh on the MXU.
# ----------------------------------------------------------------------------
def _lstm_recur_kernel(gx_ref, whh_ref, y_ref, hf_ref, cf_ref, h_st, c_st,
                       *, hidden):
    t = pl.program_id(0)

    @pl.when(t == 0)
    def _():
        h_st[...] = jnp.zeros_like(h_st)
        c_st[...] = jnp.zeros_like(c_st)

    gates = gx_ref[0] + jnp.dot(h_st[...].astype(jnp.bfloat16), whh_ref[...],
                                preferred_element_type=jnp.float32)  # (B, 4H)
    H = hidden
    i = jax.nn.sigmoid(gates[:, 0 * H:1 * H])
    f = jax.nn.sigmoid(gates[:, 1 * H:2 * H])
    g = jnp.tanh(gates[:, 2 * H:3 * H])
    o = jax.nn.sigmoid(gates[:, 3 * H:4 * H])
    c = f * c_st[...] + i * g
    h = o * jnp.tanh(c)
    h_st[...] = h
    c_st[...] = c
    y_ref[0] = h                     # hidden sequence (feeds next layer)

    @pl.when(t == pl.num_programs(0) - 1)
    def _():                         # only the last step stores final states
        hf_ref[...] = h
        cf_ref[...] = c


def lstm_layer_pallas(x_seq, wih, whh, b, pre_activation=None):
    T, B, I = x_seq.shape
    H = whh.shape[0]
    # Hoisted input projection: one (T*B, I) matmul instead of T tiny ones.
    # pre_activation="tanh" fuses the word-embedding tanh for the first layer.
    gx = linear_pallas(x_seq.reshape(T * B, I), wih, b,
                       pre_activation=pre_activation)
    gx = gx.reshape(T, B, 4 * H)

    y, h_f, c_f = pl.pallas_call(
        functools.partial(_lstm_recur_kernel, hidden=H),
        grid=(T,),
        in_specs=[
            pl.BlockSpec((1, B, 4 * H), lambda t: (t, 0, 0)),
            pl.BlockSpec((H, 4 * H), lambda t: (0, 0)),
        ],
        out_specs=[
            pl.BlockSpec((1, B, H), lambda t: (t, 0, 0)),
            pl.BlockSpec((B, H), lambda t: (0, 0)),
            pl.BlockSpec((B, H), lambda t: (0, 0)),
        ],
        out_shape=[
            jax.ShapeDtypeStruct((T, B, H), jnp.float32),
            jax.ShapeDtypeStruct((B, H), jnp.float32),
            jax.ShapeDtypeStruct((B, H), jnp.float32),
        ],
        scratch_shapes=[pltpu.VMEM((B, H), jnp.float32),
                        pltpu.VMEM((B, H), jnp.float32)],
        compiler_params=pltpu.CompilerParams(
            dimension_semantics=("arbitrary",)),   # sequential recurrence
    )(gx, whh.astype(jnp.bfloat16))
    return y, h_f, c_f


# ----------------------------------------------------------------------------
# Fused stacked-attention kernel: BOTH SAN layers in one call (shared weights,
# constant vi).  hi = ff_image(vi) + b_img + b_qst is precomputed once outside
# (so the per-layer hq matmul is bias-free).  ff_attention (N=1 linear) is a
# VPU multiply + lane reduce; the softmax divide uses the EUP approximate
# reciprocal.
# ----------------------------------------------------------------------------
def _san_kernel(vi_ref, hi_ref, u0_ref, wq_ref, wa_ref, ba_ref,
                u_ref, *, num_att_layers):
    vi = vi_ref[...]                 # (TB, R, E) f32
    hi = hi_ref[...]                 # (TB, R, C) f32 = ff_image(vi)+b_img+b_qst
    u = u0_ref[...]                  # (TB, E)    f32
    ba = ba_ref[0]                   # scalar bias of ff_attention (SMEM)
    for _ in range(num_att_layers):
        hq = jnp.dot(u.astype(jnp.bfloat16), wq_ref[...],
                     preferred_element_type=jnp.float32)      # (TB, C), bias folded
        ha = jnp.tanh(hi + hq[:, None, :])                    # (TB, R, C)
        # nn.Dropout(p=0.5) is identity in eval mode.
        scores = jnp.sum(ha * wa_ref[...], axis=-1, keepdims=True) + ba
        m = jnp.max(scores, axis=1, keepdims=True)            # softmax over R
        e = jnp.exp(scores - m)
        denom = jnp.sum(e, axis=1, keepdims=True)
        pi = e * pl.reciprocal(denom, approx=True)            # (TB, R, 1)
        vi_att = jnp.sum(pi * vi, axis=1)                     # (TB, E)
        u = vi_att + u
    u_ref[...] = u


def stacked_attention_pallas(vi, hi, u0, wq, wa, ba, num_att_layers=2):
    B, R, E = vi.shape
    C = hi.shape[2]
    if B <= 8:
        TB, Bp = B, B
    else:
        TB, Bp = 8, _round_up(B, 8)
    if Bp != B:
        vi = jnp.pad(vi, ((0, Bp - B), (0, 0), (0, 0)))
        hi = jnp.pad(hi, ((0, Bp - B), (0, 0), (0, 0)))
        u0 = jnp.pad(u0, ((0, Bp - B), (0, 0)))

    u = pl.pallas_call(
        functools.partial(_san_kernel, num_att_layers=num_att_layers),
        grid=(Bp // TB,),
        in_specs=[
            pl.BlockSpec((TB, R, E), lambda b: (b, 0, 0)),
            pl.BlockSpec((TB, R, C), lambda b: (b, 0, 0)),
            pl.BlockSpec((TB, E), lambda b: (b, 0)),
            pl.BlockSpec((E, C), lambda b: (0, 0)),
            pl.BlockSpec((1, C), lambda b: (0, 0)),
            pl.BlockSpec(memory_space=pltpu.MemorySpace.SMEM),
        ],
        out_specs=pl.BlockSpec((TB, E), lambda b: (b, 0)),
        out_shape=jax.ShapeDtypeStruct((Bp, E), jnp.float32),
        compiler_params=pltpu.CompilerParams(
            dimension_semantics=("parallel",),
            vmem_limit_bytes=32 * 1024 * 1024),
    )(vi, hi, u0,
      wq.astype(jnp.bfloat16),
      wa.reshape(1, C).astype(jnp.float32), ba.reshape(1).astype(jnp.float32))
    return u[:B]


# ----------------------------------------------------------------------------
# Parameter init (deterministic, synthetic)
# ----------------------------------------------------------------------------
def init_params(key, *, embed_size, qst_vocab_size, ans_vocab_size,
                word_embed_size, num_layers, hidden_size,
                num_channels=512, in_channels=3, ksize=3):
    ks = iter(jax.random.split(key, 64))

    def nrm(shape, scale=0.1):
        return (scale * jax.random.normal(next(ks), shape)).astype(jnp.float32)

    p = {}
    # stand-in CNN (see TODO in forward): 3x3 conv, in_channels -> 512
    p["w_conv"] = nrm((in_channels * ksize * ksize, num_channels))
    p["b_conv"] = nrm((num_channels,))
    # ImageQuestionEncoder.fc: Linear(512, embed) + Tanh
    p["w_imgfc"] = nrm((num_channels, embed_size))
    p["b_imgfc"] = nrm((embed_size,))
    # QuestionEncoder
    p["embedding"] = nrm((qst_vocab_size, word_embed_size), scale=1.0)
    p["lstm_wih"], p["lstm_whh"], p["lstm_b"] = [], [], []
    isz = word_embed_size
    for _ in range(num_layers):
        p["lstm_wih"].append(nrm((isz, 4 * hidden_size)))
        p["lstm_whh"].append(nrm((hidden_size, 4 * hidden_size)))
        # single combined bias (= b_ih + b_hh when loading real checkpoints)
        p["lstm_b"].append(nrm((4 * hidden_size,)))
        isz = hidden_size
    p["w_qstfc"] = nrm((2 * num_layers * hidden_size, embed_size))
    p["b_qstfc"] = nrm((embed_size,))
    # Attention(512, embed) -- shared by both SAN layers ([Attention]*2)
    p["w_att_img"] = nrm((embed_size, num_channels))
    p["b_att_img"] = nrm((num_channels,))
    p["w_att_qst"] = nrm((embed_size, num_channels))
    p["b_att_qst"] = nrm((num_channels,))
    p["w_att_out"] = nrm((num_channels, 1))
    p["b_att_out"] = nrm((1,))
    # final MLP: Dropout (identity, eval) + Linear(embed, ans_vocab)
    p["w_mlp"] = nrm((embed_size, ans_vocab_size))
    p["b_mlp"] = nrm((ans_vocab_size,))
    return p


# ----------------------------------------------------------------------------
# Full forward pass (glue in JAX, hot paths in Pallas)
# ----------------------------------------------------------------------------
def question_answer_forward(params, img, qst):
    B = img.shape[0]
    E = params["w_imgfc"].shape[1]
    C = params["w_att_img"].shape[1]

    # ---- ImageQuestionEncoder ----------------------------------------------
    # TODO(synk): the pretrained VGG19 feature stack (torchvision weights) is
    # replaced by a single synthetic 3x3 conv (im2col + Pallas matmul) that
    # yields the same (B, 512, 14, 14) feature map the rest of the model uses.
    patches = jax.lax.conv_general_dilated_patches(
        img, filter_shape=(3, 3), window_strides=(1, 1), padding="SAME",
        dimension_numbers=("NCHW", "OIHW", "NCHW"))       # (B, Cin*9, H, W)
    _, F, Hh, Ww = patches.shape
    R = Hh * Ww
    patches = patches.transpose(0, 2, 3, 1).reshape(B * R, F)
    feat = linear_pallas(patches, params["w_conv"], params["b_conv"])
    # view(-1, 512, 196).transpose(1, 2) then fc + Tanh
    img_feature_flat = linear_pallas(feat, params["w_imgfc"],
                                     params["b_imgfc"], activation="tanh")
    img_feature = img_feature_flat.reshape(B, R, E)       # (B, 196, E)

    # ff_image(vi) is identical for both SAN layers (vi is constant): compute
    # it once for the whole batch; fold the ff_questions bias in as well so the
    # in-kernel hq matmul needs no bias add.
    hi = linear_pallas(img_feature_flat, params["w_att_img"],
                       params["b_att_img"] + params["b_att_qst"]
                       ).reshape(B, R, C)

    # ---- QuestionEncoder ----------------------------------------------------
    qst_vec = jnp.take(params["embedding"], qst, axis=0)   # (B, T, Wemb) gather glue
    x_seq = jnp.transpose(qst_vec, (1, 0, 2))              # (T, B, Wemb)
    hs, cs = [], []
    pre_act = "tanh"   # fuse nn.Tanh() on the embedding into layer-0 projection
    for l in range(len(params["lstm_wih"])):
        x_seq, h_f, c_f = lstm_layer_pallas(
            x_seq, params["lstm_wih"][l], params["lstm_whh"][l],
            params["lstm_b"][l], pre_activation=pre_act)
        pre_act = None
        hs.append(h_f)
        cs.append(c_f)
    # cat((hidden, cell), 2).transpose(0, 1).reshape(B, -1)
    hc = jnp.stack([jnp.concatenate([h, c], axis=1) for h, c in zip(hs, cs)],
                   axis=1)                                  # (B, L, 2H)
    # tanh(hc) fused as pre-activation of the question fc
    qst_feature = linear_pallas(hc.reshape(B, -1), params["w_qstfc"],
                                params["b_qstfc"], pre_activation="tanh")

    # ---- Stacked attention (2 layers, shared weights, single fused kernel) --
    u = stacked_attention_pallas(
        img_feature, hi, qst_feature,
        params["w_att_qst"],
        params["w_att_out"], params["b_att_out"], num_att_layers=2)

    # ---- classifier MLP (dropout is identity in eval mode) ------------------
    logits = linear_pallas(u, params["w_mlp"], params["b_mlp"])
    return logits


if __name__ == "__main__":
    embed_size = 32
    qst_vocab_size = 50
    ans_vocab_size = 10
    word_embed_size = 16
    num_layers = 1
    hidden_size = 16
    B, T = 2, 8

    key = jax.random.PRNGKey(0)
    k_params, k_img, k_qst = jax.random.split(key, 3)
    params = init_params(
        k_params, embed_size=embed_size, qst_vocab_size=qst_vocab_size,
        ans_vocab_size=ans_vocab_size, word_embed_size=word_embed_size,
        num_layers=num_layers, hidden_size=hidden_size)

    img = jax.random.normal(k_img, (B, 3, 14, 14), dtype=jnp.float32)  # NCHW
    qst = jax.random.randint(k_qst, (B, T), 0, qst_vocab_size, dtype=jnp.int32)

    out = question_answer_forward(params, img, qst)
    out = jax.block_until_ready(out)
    assert out.shape == (B, ans_vocab_size), out.shape
    assert jnp.all(jnp.isfinite(out))
    print("KERNEL_OK")
</pallas_src>

<mosaic_0001>
module attributes {stable_mosaic.version = 11 : i64} {
  func.func @_linear_kernel(%arg0: i32, %arg1: i32, %arg2: i32, %arg3: memref<256x128xbf16, #tpu.memory_space<vmem>>, %arg4: memref<128x512xbf16, #tpu.memory_space<vmem>>, %arg5: memref<1x512xf32, #tpu.memory_space<vmem>>, %arg6: memref<256x512xf32, #tpu.memory_space<vmem>>, %arg7: memref<256x512xf32, #tpu.memory_space<vmem>>) attributes {dimension_semantics = [#tpu.dimension_semantics<parallel>, #tpu.dimension_semantics<parallel>, #tpu.dimension_semantics<arbitrary>], iteration_bounds = array<i64: 2, 1, 1>, scalar_prefetch = 0 : i64, scratch_operands = 1 : i64, tpu.core_type = #tpu.core_type<tc>, window_params = [{transform_indices = @transform_0, window_bounds = array<i64: 256, 128>}, {transform_indices = @transform_1, window_bounds = array<i64: 128, 512>}, {transform_indices = @transform_2, window_bounds = array<i64: 1, 512>}, {transform_indices = @transform_3, window_bounds = array<i64: 256, 512>}]} {
    %c0_i32 = arith.constant 0 : i32
    %0 = arith.cmpi eq, %arg2, %c0_i32 : i32
    %1 = arith.extui %0 : i1 to i32
    %c0_i32_0 = arith.constant 0 : i32
    %2 = arith.cmpi ne, %1, %c0_i32_0 : i32
    scf.if %2 {
      %cst_10 = arith.constant 0.000000e+00 : f32
      %12 = vector.broadcast %cst_10 : f32 to vector<256x512xf32>
      %c0_11 = arith.constant 0 : index
      %c0_12 = arith.constant 0 : index
      %13 = vector.load %arg7[%c0_11, %c0_12] : memref<256x512xf32, #tpu.memory_space<vmem>>, vector<256x512xf32>
      tpu.vector_store %arg7[%c0_11, %c0_12], %12 {strides = array<i32>} : memref<256x512xf32, #tpu.memory_space<vmem>>, vector<256x512xf32>,
    } else {
    }
    %c0 = arith.constant 0 : index
    %c0_1 = arith.constant 0 : index
    %3 = vector.load %arg3[%c0, %c0_1] : memref<256x128xbf16, #tpu.memory_space<vmem>>, vector<256x128xbf16>
    %c0_2 = arith.constant 0 : index
    %c0_3 = arith.constant 0 : index
    %4 = vector.load %arg7[%c0_2, %c0_3] : memref<256x512xf32, #tpu.memory_space<vmem>>, vector<256x512xf32>
    %c0_4 = arith.constant 0 : index
    %c0_5 = arith.constant 0 : index
    %5 = vector.load %arg4[%c0_4, %c0_5] : memref<128x512xbf16, #tpu.memory_space<vmem>>, vector<128x512xbf16>
    %cst = arith.constant dense<0.000000e+00> : vector<256x512xf32>
    %6 = tpu.matmul %3, %5, %cst {dimension_numbers = #tpu.dot_dimension_numbers<[1], [0], [0], [1], [0, 0, 1, 1], [], []>} : vector<256x128xbf16>, vector<128x512xbf16>, vector<256x512xf32> -> vector<256x512xf32>
    %7 = arith.addf %4, %6 : vector<256x512xf32>
    %c0_6 = arith.constant 0 : index
    %c0_7 = arith.constant 0 : index
    %8 = vector.load %arg7[%c0_6, %c0_7] : memref<256x512xf32, #tpu.memory_space<vmem>>, vector<256x512xf32>
    tpu.vector_store %arg7[%c0_6, %c0_7], %7 {strides = array<i32>} : memref<256x512xf32, #tpu.memory_space<vmem>>, vector<256x512xf32>,
    %c0_i32_8 = arith.constant 0 : i32
    %9 = arith.cmpi eq, %arg2, %c0_i32_8 : i32
    %10 = arith.extui %9 : i1 to i32
    %c0_i32_9 = arith.constant 0 : i32
    %11 = arith.cmpi ne, %10, %c0_i32_9 : i32
    scf.if %11 {
      %c0_10 = arith.constant 0 : index
      %c0_11 = arith.constant 0 : index
      %12 = vector.load %arg7[%c0_10, %c0_11] : memref<256x512xf32, #tpu.memory_space<vmem>>, vector<256x512xf32>
      %c0_12 = arith.constant 0 : index
      %c0_13 = arith.constant 0 : index
      %13 = vector.load %arg5[%c0_12, %c0_13] : memref<1x512xf32, #tpu.memory_space<vmem>>, vector<1x512xf32>
      %14 = vector.broadcast %13 : vector<1x512xf32> to vector<256x512xf32>
      %15 = arith.addf %12, %14 : vector<256x512xf32>
      %c0_14 = arith.constant 0 : index
      %c0_15 = arith.constant 0 : index
      %16 = vector.load %arg6[%c0_14, %c0_15] : memref<256x512xf32, #tpu.memory_space<vmem>>, vector<256x512xf32>
      tpu.vector_store %arg6[%c0_14, %c0_15], %15 {strides = array<i32>} : memref<256x512xf32, #tpu.memory_space<vmem>>, vector<256x512xf32>,
    } else {
    }
    return
  }
  func.func @transform_0(%arg0: i32, %arg1: i32, %arg2: i32) -> (i32, i32) {
    %c0_i32 = arith.constant 0 : i32
    return %arg0, %arg2 : i32, i32
  }
  func.func @transform_1(%arg0: i32, %arg1: i32, %arg2: i32) -> (i32, i32) {
    %c0_i32 = arith.constant 0 : i32
    return %arg2, %arg1 : i32, i32
  }
  func.func @transform_2(%arg0: i32, %arg1: i32, %arg2: i32) -> (i32, i32) {
    %c0_i32 = arith.constant 0 : i32
    %c0_i32_0 = arith.constant 0 : i32
    return %c0_i32, %arg1 : i32, i32
  }
  func.func @transform_3(%arg0: i32, %arg1: i32, %arg2: i32) -> (i32, i32) {
    %c0_i32 = arith.constant 0 : i32
    return %arg0, %arg1 : i32, i32
  }
}

</mosaic_0001>

<bundles_post_ra>
// kernel: tpu_custom_call.1
= control target key start
LH: loop header
LB: loop body
LE: loop exit
PB: predicated region body
PF: predicated region fallthrough
CT: control target
= control target key end

     0   :  { %8 = vsyncpa [#allocation4], 0  ;;  %s2959_s0 = inlined_call_operand.hbm [shape: bf16[512,128], index: 0, kind: input, shape index: {}]   ;;  %s2960_s1 = inlined_call_operand.hbm [shape: bf16[128,512], index: 1, kind: input, shape index: {}]   ;;  %s2961_s2 = inlined_call_operand.hbm [shape: f32[1,512], index: 2, kind: input, shape index: {}]   ;;  %s2962_s3 = inlined_call_operand.hbm [shape: f32[512,512], index: 3, kind: output, shape index: {}]  }
   0x1   :  { %10 = vsyncpa [#allocation4 + $0x1], 0 }
   0x2   :  { %11 = vsyncpa [#allocation7], 0 }
   0x3   :  { %12 = vsyncpa [#allocation5], 0 }
   0x4   :  { %14 = vsyncpa [#allocation5 + $0x1], 0  ;;  %s2453_s12 = smov 0   ;;  %s2455_s13 = smov 0  }
   0x5   :  { %s2457_s14 = smov 0   ;;  %s2459_s15 = smov 0  }
   0x6   :  { %s2461_s16 = smov 0   ;;  %s2463_s17 = smov 0  }
   0x7 LB: > { %s2031_s18 = sadd.s32 4294967295, %s2420_s17   ;;  %s2032_s19 = sadd.s32 4294967294, %s2420_s17   ;;  %s2420_s17 = sphi %s2463_s17, %s20_s17   ;;  %s2416_s16 = sphi %s2461_s16, %s2982_s16   ;;  %s2412_s15 = sphi %s2459_s15, %s2981_s15   ;;  %s2408_s14 = sphi %s2457_s14, %s2980_s14   ;;  %s2404_s13 = sphi %s2455_s13, %s2979_s13   ;;  %s2400_s12 = sphi %s2453_s12, %s2978_s12  }
   0x8   : > { %p61_p0 = scmp.ne.s32.totalorder %s2404_s13, %s2400_s12  ;;  %p2487_p1 = scmp.eq.s32.totalorder %s2031_s18, 0 }
   0x9   : > { %p2491_p2 = scmp.eq.s32.totalorder %s2031_s18, 1  ;;  %p147_p3 = scmp.eq.s32.totalorder %s2032_s19, 1 }
   0xa   : > { %s2966_s20 = scalar_select %p2487_p1, 1, 0 }
   0xb   : > { %p2497_p4 = por %p2487_p1, %p61_p0  ;;  %p2033_p5 = scmp.ge.s32.totalorder %s2420_s17, 1 }
   0xc   : > { %p2502_p6 = por %p147_p3, %p61_p0  ;;  %p154_p7 = scmp.lt.s32.totalorder %s2420_s17, 3 }
   0xd   : > { %s2968_s22 = scalar_select %p2497_p4, 1, 0 }
   0xe   : > { %s2969_s23 = scalar_select %p2502_p6, 1, 0 }
   0xf   : > { %p2507_p8 = pnand %p2033_p5, %p154_p7  ;;  %s2422_s25 = smov [#allocation6]  }
  0x10   : > { %s172_s26 = sshll.u32 %s2422_s25, 4  ;;  %s2423_s28 = smov [#allocation8]   ;;  %s173_s26 = int_to_ptr.vmem [resolvable:$true] %s172_s26 }
  0x11   : > { %p2114_p9 = pneg %p2507_p8  ;;  %s189_s29 = sshll.u32 %s2423_s28, 4  ;;  %s190_s29 = int_to_ptr.vmem [resolvable:$true] %s189_s29 }
  0x12   : > { %s2267_s30 = scalar_lea.vmem %s173_s26, 4096  ;;  %p2275_p5 = scmp.lt.s32.totalorder %s173_s26, %s173_s26 }
  0x13   : > { %p2516_p11 = pnand %p2114_p9, %p2487_p1  ;;  %p2268_p13 = scmp.ne.s32.totalorder %s173_s26, %s2267_s30 }
  0x14   : > { %p2276_p7 = scmp.lt.s32.totalorder %s2267_s30, %s2267_s30 }
  0x15   : > { %p2258_p12 = pneg %p2516_p11 }
  0x16   : > { %p2277_p10 = por %p2276_p7, %p2275_p5 }
  0x17   : > { %p2270_p0 = pnand %p2268_p13, %p2258_p12 }
  0x19   : > { %p2271_p3 = pneg %p2270_p0 }
  0x1b   : > { %p2278_p9 = pnand %p2277_p10, %p2271_p3 }
  0x1d   : > { %2281 = shalt.err (!%p2278_p9)
}
  0x1e   : > { %s2424_s4 = smov 256   ;;  %s2425_s5 = smov 16  }
  0x1f   : > { %2117 = dma.hbm_to_vmem [thread:$0]  (!%p2516_p11), %s2960_s1, 4096, %s173_s26, [#allocation7], %s2424_s4, %s2424_s4, %s2425_s5  }
  0x20   : > { %s2293_s8 = scalar_lea.vmem %s190_s29, 64  ;;  %p2301_p1 = scmp.lt.s32.totalorder %s190_s29, %s190_s29 }
  0x21   : > { %p2294_p6 = scmp.ne.s32.totalorder %s190_s29, %s2293_s8  ;;  %p2302_p4 = scmp.lt.s32.totalorder %s2293_s8, %s2293_s8 }
  0x23   : > { %p2296_p13 = pnand %p2294_p6, %p2258_p12  ;;  %p2303_p5 = por %p2302_p4, %p2301_p1 }
  0x25   : > { %p2297_p0 = pneg %p2296_p13 }
  0x27   : > { %p2304_p10 = pnand %p2303_p5, %p2297_p0 }
  0x29   : > { %2307 = shalt.err (!%p2304_p10)
}
  0x2a   : > { %2120 = dma.hbm_to_vmem [thread:$0]  (!%p2516_p11), %s2961_s2, 64, %s190_s29, [#allocation7]  }
  0x2b   : > { %s39_s11 = sadd.s32 1, %s2416_s16  ;;  %s48_s18 = sadd.s32 1, %s2408_s14 }
  0x2c   : > { %p41_p1 = scmp.ge.s32.totalorder %s39_s11, 2  ;;  %p55_p4 = scmp.ne.s32.totalorder %s2408_s14, %s2404_s13 }
  0x2d   : > { %p56_p6 = scmp.eq.s32.totalorder %s2420_s17, 0  ;;  %p2131_p12 = scmp.lt.s32.totalorder %s2420_s17, 2 }
  0x2e   : > { %s2984_s11 = smov (%p41_p1, %s39_s11), 0  ;;  %p2548_p7 = por %p2491_p2, %p55_p4 }
  0x2f   : > { %p57_p3 = por %p56_p6, %p55_p4  ;;  %s43_s25 = ssub.s32 %s2416_s16, %s2984_s11 }
  0x30   : > { %s200_s26 = sand.u32 1, %s2408_s14   ;;  %p46_p9 = scmp.eq.s32.totalorder %s43_s25, 0 }
  0x31   : > { %s2037_s27 = sshll.u32 %s200_s26, 7  ;;  %s2099_s28 = sshll.u32 %s2416_s16, 11 }
  0x32   : > { %s2557_s29 = scalar_select %p46_p9, %s2408_s14, %s48_s18  }
  0x33   : > { %s211_s5 = scalar_lea.hbm %s2959_s0, %s2099_s28  ;;  %s204_s6 = scalar_lea.vmem [#allocation3], %s2037_s27 }
  0x34   : > { %s212_s7 = sshll.u32 %s204_s6, 4  ;;  %p2564_p11 = pnand %p2131_p12, %p57_p3  ;;  %s213_s7 = int_to_ptr.vmem [resolvable:$true] %s212_s7 }
  0x35   : > { %s201_s8 = scalar_lea.sflag [#allocation4], %s200_s26  ;;  %s2321_s9 = scalar_lea.vmem %s213_s7, 2048 }
  0x36   : > { %p2310_p2 = pneg %p2564_p11  ;;  %p2322_p13 = scmp.ne.s32.totalorder %s213_s7, %s2321_s9 }
  0x37   : > { %s2426_s10 = smov [#allocation3]  }
  0x38   : > { %p2324_p0 = pnand %p2322_p13, %p2310_p2  ;;  %s2326_s18 = sshll.u32 %s2426_s10, 4  ;;  %s2327_s18 = int_to_ptr.vmem [resolvable:$false] %s2326_s18 }
  0x39   : > { %s2328_s25 = scalar_lea.vmem %s2327_s18, 4096  ;;  %p2329_p10 = scmp.lt.s32.totalorder %s213_s7, %s2327_s18 }
  0x3a   : > { %p2325_p5 = pneg %p2324_p0  ;;  %p2330_p1 = scmp.lt.s32.totalorder %s2328_s25, %s2321_s9 }
  0x3c   : > { %p2331_p4 = por %p2330_p1, %p2329_p10 }
  0x3e   : > { %p2332_p6 = pnand %p2331_p4, %p2325_p5 }
  0x40   : > { %2335 = shalt.err (!%p2332_p6)
}
  0x41   : > { %s2427_s27 = smov 64   ;;  %s2428_s28 = smov 4  }
  0x42   : > { %2124 = dma.hbm_to_vmem [thread:$0]  (!%p2564_p11), %s211_s5, 2048, %s213_s7, %s201_s8, %s2427_s27, %s2427_s27, %s2428_s28  }
  0x43   : > { %224 = sbr.rel (%p2507_p8) target bundleno = 445 (0x1bd), region = 32  ;;  %s2575_s26 = sand.u32 (!%p2507_p8), 1, %s2404_s13  }
  0x44   : > { %s2041_s30 = sshll.u32 (!%p2507_p8), %s2575_s26, 7  ;;  %s227_s4 = scalar_lea.sflag (!%p2507_p8), [#allocation4], %s2575_s26 }
  0x45   : > { %s2579_s6 = scalar_lea.vmem (!%p2507_p8), [#allocation3], %s2041_s30  ;;  %p2974_p12 = scmp.ne.s32.totalorder (!%p2507_p8), %s2968_s22, 0 }
  0x48   : > { %2387 = dma.done.wait (%p2974_p12), %s227_s4, 2048  }
  0x49   : > { %2389 = vsyncadd (%p2974_p12), %s227_s4, 4294965248  ;;  %p2975_p3 = scmp.ne.s32.totalorder %s2966_s20, 0 }
  0x4b   : > { %2391 = dma.done.wait (%p2975_p3), [#allocation7], 4160  }
  0x4c   : > { %2393 = vsyncadd (%p2975_p3), [#allocation7], 4294963136  ;;  %v2429_v0 = vmov 0   ;;  %v2192_v1 = vld [vmem:[#allocation6 + $0xe4] ss:$16 sps:$4 sm:$0xff]   ;;  %v2241_v34 = vld [vmem:[%s2579_s6 + $0x8] sm:$0xff]   ;;  %v1623_v49 = vlaneseq }
  0x4d   : > { %880 = vmatprep.mubr.bf16.mxu0 %v2429_v0  ;;  %1073 = vmatprep.mubr.bf16.mxu1 %v2429_v0  ;;  %v2194_v2 = vld [vmem:[#allocation6 + $0xec] ss:$16 sps:$4 sm:$0xff]   ;;  %v2196_v3 = vld [vmem:[#allocation6 + $0xe0] ss:$16 sps:$4 sm:$0xff]   ;;  %v2197_v4 = vld [vmem:[#allocation6 + $0xe8] ss:$16 sps:$4 sm:$0xff]  }
  0x4e   : > { %848 = vmatprep.subr.bf16.mxu0 %v2192_v1  ;;  %1041 = vmatprep.subr.bf16.mxu1 %v2194_v2  ;;  %v2198_v5 = vld [vmem:[#allocation6 + $0xc4] ss:$16 sps:$4 sm:$0xff]   ;;  %v2200_v6 = vld [vmem:[#allocation6 + $0xcc] ss:$16 sps:$4 sm:$0xff]   ;;  %v2202_v7 = vld [vmem:[#allocation6 + $0xc0] ss:$16 sps:$4 sm:$0xff]  }
  0x4f   : > { %849 = vmatpush1.bf16.msra.mxu0 %v2196_v3  ;;  %1042 = vmatpush1.bf16.msra.mxu1 %v2197_v4  ;;  %v2203_v8 = vld [vmem:[#allocation6 + $0xc8] ss:$16 sps:$4 sm:$0xff]   ;;  %v2204_v9 = vld [vmem:[#allocation6 + $0xa4] ss:$16 sps:$4 sm:$0xff]   ;;  %v2206_v10 = vld [vmem:[#allocation6 + $0xac] ss:$16 sps:$4 sm:$0xff]  }
  0x50   : > { %850 = vmatprep.subr.bf16.mxu0 %v2198_v5  ;;  %1043 = vmatprep.subr.bf16.mxu1 %v2200_v6  ;;  %v2208_v11 = vld [vmem:[#allocation6 + $0xa0] ss:$16 sps:$4 sm:$0xff]   ;;  %v2209_v12 = vld [vmem:[#allocation6 + $0xa8] ss:$16 sps:$4 sm:$0xff]   ;;  %v2210_v13 = vld [vmem:[#allocation6 + $0x84] ss:$16 sps:$4 sm:$0xff]  }
  0x51   : > { %v2212_v14 = vld [vmem:[#allocation6 + $0x8c] ss:$16 sps:$4 sm:$0xff]   ;;  %v2214_v15 = vld [vmem:[#allocation6 + $0x80] ss:$16 sps:$4 sm:$0xff]   ;;  %v2215_v16 = vld [vmem:[#allocation6 + $0x88] ss:$16 sps:$4 sm:$0xff]  }
  0x52   : > { %v2216_v17 = vld [vmem:[#allocation6 + $0x64] ss:$16 sps:$4 sm:$0xff]   ;;  %v2218_v18 = vld [vmem:[#allocation6 + $0x6c] ss:$16 sps:$4 sm:$0xff]   ;;  %v2220_v19 = vld [vmem:[#allocation6 + $0x60] ss:$16 sps:$4 sm:$0xff]  }
  0x53   : > { %851 = vmatpush1.bf16.msra.mxu0 %v2202_v7  ;;  %1044 = vmatpush1.bf16.msra.mxu1 %v2203_v8  ;;  %v2221_v20 = vld [vmem:[#allocation6 + $0x68] ss:$16 sps:$4 sm:$0xff]   ;;  %v2222_v21 = vld [vmem:[#allocation6 + $0x44] ss:$16 sps:$4 sm:$0xff]   ;;  %v2224_v22 = vld [vmem:[#allocation6 + $0x4c] ss:$16 sps:$4 sm:$0xff]  }
  0x54   : > { %852 = vmatprep.subr.bf16.mxu0 %v2204_v9  ;;  %1045 = vmatprep.subr.bf16.mxu1 %v2206_v10  ;;  %v2226_v23 = vld [vmem:[#allocation6 + $0x40] ss:$16 sps:$4 sm:$0xff]   ;;  %v2227_v24 = vld [vmem:[#allocation6 + $0x48] ss:$16 sps:$4 sm:$0xff]   ;;  %v2228_v25 = vld [vmem:[#allocation6 + $0x24] ss:$16 sps:$4 sm:$0xff]  }
  0x55   : > { %v2230_v26 = vld [vmem:[#allocation6 + $0x2c] ss:$16 sps:$4 sm:$0xff]   ;;  %v2232_v27 = vld [vmem:[#allocation6 + $0x20] ss:$16 sps:$4 sm:$0xff]   ;;  %v2233_v28 = vld [vmem:[#allocation6 + $0x28] ss:$16 sps:$4 sm:$0xff]  }
  0x56   : > { %v2234_v29 = vld [vmem:[#allocation6 + $0x4] ss:$16 sps:$4 sm:$0xff]   ;;  %v2236_v30 = vld [vmem:[#allocation6 + $0xc] ss:$16 sps:$4 sm:$0xff]   ;;  %v2238_v31 = vld [vmem:[#allocation6] ss:$16 sps:$4 sm:$0xff]  }
  0x57   : > { %853 = vmatpush1.bf16.msra.mxu0 %v2208_v11  ;;  %1046 = vmatpush1.bf16.msra.mxu1 %v2209_v12  ;;  %v2239_v32 = vld [vmem:[#allocation6 + $0x8] ss:$16 sps:$4 sm:$0xff]   ;;  %v2240_v33 = vld [vmem:[%s2579_s6] sm:$0xff]   ;;  %v2242_v35 = vld [vmem:[%s2579_s6 + $0x10] sm:$0xff]   ;;  %v1624_v50 = vshrl.u32 %v1623_v49, 7  ;;  %s2044_s20 = sshll.u32 %s2575_s26, 10 }
  0x58   : > { %854 = vmatprep.subr.bf16.mxu0 %v2210_v13  ;;  %1047 = vmatprep.subr.bf16.mxu1 %v2212_v14  ;;  %v2243_v36 = vld [vmem:[%s2579_s6 + $0x18] sm:$0xff]   ;;  %v2244_v37 = vld [vmem:[%s2579_s6 + $0x20] sm:$0xff]   ;;  %v2245_v38 = vld [vmem:[%s2579_s6 + $0x28] sm:$0xff]   ;;  %s2648_s22 = scalar_lea.vmem [#allocation9], %s2044_s20  ;;  %s2101_s24 = sshll.u32 %s2412_s15, 14 }
  0x59   : > { %v2246_v39 = vld [vmem:[%s2579_s6 + $0x30] sm:$0xff]   ;;  %v2247_v40 = vld [vmem:[%s2579_s6 + $0x38] sm:$0xff]   ;;  %v2248_v41 = vld [vmem:[%s2579_s6 + $0x40] sm:$0xff]   ;;  %v1625_v51 = vsub.s32 0, %v1624_v50  ;;  %v1633_v52 = vsub.s32 2, %v1624_v50  ;;  %v1629_v54 = vsub.s32 1, %v1624_v50  ;;  %s2903_s8 = scalar_lea.hbm %s2962_s3, %s2101_s24 }
  0x5a   : > { %v2249_v42 = vld [vmem:[%s2579_s6 + $0x48] sm:$0xff]   ;;  %v2250_v43 = vld [vmem:[%s2579_s6 + $0x50] sm:$0xff]   ;;  %v2251_v44 = vld [vmem:[%s2579_s6 + $0x58] sm:$0xff]   ;;  %v1637_v55 = vsub.s32 3, %v1624_v50  ;;  %s1916_s5 = sshll.u32 %s2648_s22, 4  ;;  %s1900_s15 = scalar_lea.sflag [#allocation5], %s2575_s26  ;;  %s2905_s5 = int_to_ptr.vmem [resolvable:$true] %s1916_s5 }
  0x5b   : > { %855 = vmatpush1.bf16.msra.mxu0 %v2214_v15  ;;  %1048 = vmatpush1.bf16.msra.mxu1 %v2215_v16  ;;  %v2252_v45 = vld [vmem:[%s2579_s6 + $0x60] sm:$0xff]   ;;  %v2253_v46 = vld [vmem:[%s2579_s6 + $0x68] sm:$0xff]   ;;  %v2254_v47 = vld [vmem:[%s2579_s6 + $0x70] sm:$0xff]   ;;  %s2336_s9 = scalar_lea.vmem %s2905_s5, 16384  ;;  %s2430_s10 = smov [#allocation9]  }
  0x5c   : > { %856 = vmatprep.subr.bf16.mxu0 %v2216_v17  ;;  %1049 = vmatprep.subr.bf16.mxu1 %v2218_v18  ;;  %v2255_v48 = vld [vmem:[%s2579_s6 + $0x78] sm:$0xff]   ;;  %v1621_v53 = vld [vmem:[#allocation8] sm:$0xf]  ;;  %p2337_p8 = scmp.ne.s32.totalorder %s2905_s5, %s2336_s9  ;;  %s2340_s18 = sshll.u32 %s2430_s10, 4  ;;  %s2341_s18 = int_to_ptr.vmem [resolvable:$false] %s2340_s18 }
  0x5d   : > { %v2638_v56 = vrot.slane %v1621_v53, %v1625_v51  ;;  %v2640_v57 = vrot.slane %v1621_v53, %v1633_v52  ;;  %v2642_v58 = vrot.slane %v1621_v53, %v1629_v54  ;;  %v2644_v59 = vrot.slane %v1621_v53, %v1637_v55  ;;  %s2342_s25 = scalar_lea.vmem %s2341_s18, 32768  ;;  %p2343_p2 = scmp.lt.s32.totalorder %s2905_s5, %s2341_s18 }
  0x5e   : > { %p2338_p9 = pnand %p2337_p8, %p2548_p7  ;;  %p2344_p13 = scmp.lt.s32.totalorder %s2342_s25, %s2336_s9 }
  0x5f   : > { %857 = vmatpush1.bf16.msra.mxu0 %v2220_v19  ;;  %1050 = vmatpush1.bf16.msra.mxu1 %v2221_v20 }
  0x60   : > { %858 = vmatprep.subr.bf16.mxu0 %v2222_v21  ;;  %1051 = vmatprep.subr.bf16.mxu1 %v2224_v22  ;;  %p2339_p11 = pneg %p2338_p9  ;;  %p2345_p0 = por %p2344_p13, %p2343_p2 }
  0x62   : > { %p2346_p5 = pnand %p2345_p0, %p2339_p11 }
  0x63   : > { %859 = vmatpush1.bf16.msra.mxu0 %v2226_v23  ;;  %1052 = vmatpush1.bf16.msra.mxu1 %v2227_v24 }
  0x64   : > { %860 = vmatprep.subr.bf16.mxu0 %v2228_v25  ;;  %1053 = vmatprep.subr.bf16.mxu1 %v2230_v26 }
  0x67   : > { %861 = vmatpush1.bf16.msra.mxu0 %v2232_v27  ;;  %1054 = vmatpush1.bf16.msra.mxu1 %v2233_v28 }
  0x68   : > { %862 = vmatprep.subr.bf16.mxu0 %v2234_v29  ;;  %1055 = vmatprep.subr.bf16.mxu1 %v2236_v30 }
  0x6b   : > { %863 = vmatpush1.bf16.msra.mxu0 %v2238_v31  ;;  %1056 = vmatpush1.bf16.msra.mxu1 %v2239_v32 }
  0x6e   : > { %881 = vmatmul.mubr.bf16.vlgmr.msra.gmra.mxu0 %v2240_v33  ;;  %1074 = vmatmul.mubr.bf16.vlgmr.msra.gmra.mxu1 %v2240_v33 }
  0x6f   : > { %890 = vmatprep.mubr.bf16.mxu0 %v2429_v0  ;;  %1083 = vmatprep.mubr.bf16.mxu1 %v2429_v0 }
  0x76   : > { %891 = vmatmul.mubr.bf16.gmra.mxu0 %v2241_v34  ;;  %1084 = vmatmul.mubr.bf16.gmra.mxu1 %v2241_v34 }
  0x77   : > { %900 = vmatprep.mubr.bf16.mxu0 %v2429_v0  ;;  %1093 = vmatprep.mubr.bf16.mxu1 %v2429_v0 }
  0x7e   : > { %901 = vmatmul.mubr.bf16.gmra.mxu0 %v2242_v35  ;;  %1094 = vmatmul.mubr.bf16.gmra.mxu1 %v2242_v35 }
  0x7f   : > { %910 = vmatprep.mubr.bf16.mxu0 %v2429_v0  ;;  %1103 = vmatprep.mubr.bf16.mxu1 %v2429_v0 }
  0x86   : > { %911 = vmatmul.mubr.bf16.gmra.mxu0 %v2243_v36  ;;  %1104 = vmatmul.mubr.bf16.gmra.mxu1 %v2243_v36 }
  0x87   : > { %920 = vmatprep.mubr.bf16.mxu0 %v2429_v0  ;;  %1113 = vmatprep.mubr.bf16.mxu1 %v2429_v0 }
  0x8e   : > { %921 = vmatmul.mubr.bf16.gmra.mxu0 %v2244_v37  ;;  %1114 = vmatmul.mubr.bf16.gmra.mxu1 %v2244_v37 }
  0x8f   : > { %930 = vmatprep.mubr.bf16.mxu0 %v2429_v0  ;;  %1123 = vmatprep.mubr.bf16.mxu1 %v2429_v0 }
  0x96   : > { %931 = vmatmul.mubr.bf16.gmra.mxu0 %v2245_v38  ;;  %1124 = vmatmul.mubr.bf16.gmra.mxu1 %v2245_v38 }
  0x97   : > { %940 = vmatprep.mubr.bf16.mxu0 %v2429_v0  ;;  %1133 = vmatprep.mubr.bf16.mxu1 %v2429_v0 }
  0x9e   : > { %941 = vmatmul.mubr.bf16.gmra.mxu0 %v2246_v39  ;;  %1134 = vmatmul.mubr.bf16.gmra.mxu1 %v2246_v39 }
  0x9f   : > { %950 = vmatprep.mubr.bf16.mxu0 %v2429_v0  ;;  %1143 = vmatprep.mubr.bf16.mxu1 %v2429_v0 }
  0xa6   : > { %951 = vmatmul.mubr.bf16.gmra.mxu0 %v2247_v40  ;;  %1144 = vmatmul.mubr.bf16.gmra.mxu1 %v2247_v40 }
  0xa7   : > { %960 = vmatprep.mubr.bf16.mxu0 %v2429_v0  ;;  %1153 = vmatprep.mubr.bf16.mxu1 %v2429_v0 }
  0xae   : > { %961 = vmatmul.mubr.bf16.gmra.mxu0 %v2248_v41  ;;  %1154 = vmatmul.mubr.bf16.gmra.mxu1 %v2248_v41 }
  0xaf   : > { %970 = vmatprep.mubr.bf16.mxu0 %v2429_v0  ;;  %1163 = vmatprep.mubr.bf16.mxu1 %v2429_v0 }
  0xb6   : > { %971 = vmatmul.mubr.bf16.gmra.mxu0 %v2249_v42  ;;  %1164 = vmatmul.mubr.bf16.gmra.mxu1 %v2249_v42 }
  0xb7   : > { %980 = vmatprep.mubr.bf16.mxu0 %v2429_v0  ;;  %1173 = vmatprep.mubr.bf16.mxu1 %v2429_v0 }
  0xbe   : > { %981 = vmatmul.mubr.bf16.gmra.mxu0 %v2250_v43  ;;  %1174 = vmatmul.mubr.bf16.gmra.mxu1 %v2250_v43 }
  0xbf   : > { %990 = vmatprep.mubr.bf16.mxu0 %v2429_v0  ;;  %1183 = vmatprep.mubr.bf16.mxu1 %v2429_v0 }
  0xc6   : > { %991 = vmatmul.mubr.bf16.gmra.mxu0 %v2251_v44  ;;  %1184 = vmatmul.mubr.bf16.gmra.mxu1 %v2251_v44 }
  0xc7   : > { %1000 = vmatprep.mubr.bf16.mxu0 %v2429_v0  ;;  %1193 = vmatprep.mubr.bf16.mxu1 %v2429_v0 }
  0xce   : > { %1001 = vmatmul.mubr.bf16.gmra.mxu0 %v2252_v45  ;;  %1194 = vmatmul.mubr.bf16.gmra.mxu1 %v2252_v45 }
  0xcf   : > { %1010 = vmatprep.mubr.bf16.mxu0 %v2429_v0  ;;  %1203 = vmatprep.mubr.bf16.mxu1 %v2429_v0 }
  0xd6   : > { %1011 = vmatmul.mubr.bf16.gmra.mxu0 %v2253_v46  ;;  %1204 = vmatmul.mubr.bf16.gmra.mxu1 %v2253_v46 }
  0xd7   : > { %1020 = vmatprep.mubr.bf16.mxu0 %v2429_v0  ;;  %1213 = vmatprep.mubr.bf16.mxu1 %v2429_v0 }
  0xde   : > { %1021 = vmatmul.mubr.bf16.gmra.mxu0 %v2254_v47  ;;  %1214 = vmatmul.mubr.bf16.gmra.mxu1 %v2254_v47 }
  0xdf   : > { %1030 = vmatprep.mubr.bf16.mxu0 %v2429_v0  ;;  %1223 = vmatprep.mubr.bf16.mxu1 %v2429_v0 }
  0xe6   : > { %1031 = vmatmul.mubr.bf16.gmra.mxu0 %v2255_v48  ;;  %1224 = vmatmul.mubr.bf16.gmra.mxu1 %v2255_v48 }
 0x12e   : > { %v882_v60 = vpop.f32.mrf.mxu0  ;;  %v1075_v61 = vpop.f32.mrf.mxu1 }
 0x12f   : > { %v1643_v62 = vadd.f32 %v2638_v56, %v882_v60  ;;  %v1645_v63 = vadd.f32 %v2640_v57, %v1075_v61 }
 0x130   : > { %v884_v0 = vpop.f32.mrf.mxu0  ;;  %v1077_v1 = vpop.f32.mrf.mxu1 }
 0x131   : > { %1771 = vst [vmem:[%s2648_s22] sm:$0xff] %v1643_v62  ;;  %1773 = vst [vmem:[%s2648_s22 + $0x10] sm:$0xff] %v1645_v63  ;;  %v1644_v2 = vadd.f32 %v2642_v58, %v884_v0  ;;  %v1646_v3 = vadd.f32 %v2644_v59, %v1077_v1 }
 0x132   : > { %v886_v4 = vpop.f32.mrf.mxu0  ;;  %v1079_v5 = vpop.f32.mrf.mxu1 }
 0x133   : > { %1772 = vst [vmem:[%s2648_s22 + $0x8] sm:$0xff] %v1644_v2  ;;  %1774 = vst [vmem:[%s2648_s22 + $0x18] sm:$0xff] %v1646_v3  ;;  %v1647_v6 = vadd.f32 %v2638_v56, %v886_v4  ;;  %v1649_v7 = vadd.f32 %v2640_v57, %v1079_v5 }
 0x134   : > { %v888_v8 = vpop.f32.mrf.mxu0  ;;  %v1081_v9 = vpop.f32.mrf.mxu1 }
 0x135   : > { %1775 = vst [vmem:[%s2648_s22 + $0x20] sm:$0xff] %v1647_v6  ;;  %1777 = vst [vmem:[%s2648_s22 + $0x30] sm:$0xff] %v1649_v7  ;;  %v1648_v10 = vadd.f32 %v2642_v58, %v888_v8  ;;  %v1650_v11 = vadd.f32 %v2644_v59, %v1081_v9 }
 0x136   : > { %v892_v12 = vpop.f32.mrf.mxu0  ;;  %v1085_v13 = vpop.f32.mrf.mxu1 }
 0x137   : > { %1776 = vst [vmem:[%s2648_s22 + $0x28] sm:$0xff] %v1648_v10  ;;  %1778 = vst [vmem:[%s2648_s22 + $0x38] sm:$0xff] %v1650_v11  ;;  %v1651_v14 = vadd.f32 %v2638_v56, %v892_v12  ;;  %v1653_v15 = vadd.f32 %v2640_v57, %v1085_v13 }
 0x138   : > { %v894_v16 = vpop.f32.mrf.mxu0  ;;  %v1087_v17 = vpop.f32.mrf.mxu1 }
 0x139   : > { %1779 = vst [vmem:[%s2648_s22 + $0x40] sm:$0xff] %v1651_v14  ;;  %1781 = vst [vmem:[%s2648_s22 + $0x50] sm:$0xff] %v1653_v15  ;;  %v1652_v18 = vadd.f32 %v2642_v58, %v894_v16  ;;  %v1654_v19 = vadd.f32 %v2644_v59, %v1087_v17 }
 0x13a   : > { %v896_v20 = vpop.f32.mrf.mxu0  ;;  %v1089_v21 = vpop.f32.mrf.mxu1 }
 0x13b   : > { %1780 = vst [vmem:[%s2648_s22 + $0x48] sm:$0xff] %v1652_v18  ;;  %1782 = vst [vmem:[%s2648_s22 + $0x58] sm:$0xff] %v1654_v19  ;;  %v1655_v22 = vadd.f32 %v2638_v56, %v896_v20  ;;  %v1657_v23 = vadd.f32 %v2640_v57, %v1089_v21 }
 0x13c   : > { %v898_v24 = vpop.f32.mrf.mxu0  ;;  %v1091_v25 = vpop.f32.mrf.mxu1 }
 0x13d   : > { %1783 = vst [vmem:[%s2648_s22 + $0x60] sm:$0xff] %v1655_v22  ;;  %1785 = vst [vmem:[%s2648_s22 + $0x70] sm:$0xff] %v1657_v23  ;;  %v1656_v26 = vadd.f32 %v2642_v58, %v898_v24  ;;  %v1658_v27 = vadd.f32 %v2644_v59, %v1091_v25 }
 0x13e   : > { %v902_v28 = vpop.f32.mrf.mxu0  ;;  %v1095_v29 = vpop.f32.mrf.mxu1 }
 0x13f   : > { %1784 = vst [vmem:[%s2648_s22 + $0x68] sm:$0xff] %v1656_v26  ;;  %1786 = vst [vmem:[%s2648_s22 + $0x78] sm:$0xff] %v1658_v27  ;;  %v1659_v30 = vadd.f32 %v2638_v56, %v902_v28  ;;  %v1661_v31 = vadd.f32 %v2640_v57, %v1095_v29 }
 0x140   : > { %v904_v32 = vpop.f32.mrf.mxu0  ;;  %v1097_v33 = vpop.f32.mrf.mxu1 }
 0x141   : > { %1787 = vst [vmem:[%s2648_s22 + $0x80] sm:$0xff] %v1659_v30  ;;  %1789 = vst [vmem:[%s2648_s22 + $0x90] sm:$0xff] %v1661_v31  ;;  %v1660_v34 = vadd.f32 %v2642_v58, %v904_v32  ;;  %v1662_v35 = vadd.f32 %v2644_v59, %v1097_v33 }
 0x142   : > { %v906_v36 = vpop.f32.mrf.mxu0  ;;  %v1099_v37 = vpop.f32.mrf.mxu1 }
 0x143   : > { %1788 = vst [vmem:[%s2648_s22 + $0x88] sm:$0xff] %v1660_v34  ;;  %1790 = vst [vmem:[%s2648_s22 + $0x98] sm:$0xff] %v1662_v35  ;;  %v1663_v38 = vadd.f32 %v2638_v56, %v906_v36  ;;  %v1665_v39 = vadd.f32 %v2640_v57, %v1099_v37 }
 0x144   : > { %v908_v40 = vpop.f32.mrf.mxu0  ;;  %v1101_v41 = vpop.f32.mrf.mxu1 }
 0x145   : > { %1791 = vst [vmem:[%s2648_s22 + $0xa0] sm:$0xff] %v1663_v38  ;;  %1793 = vst [vmem:[%s2648_s22 + $0xb0] sm:$0xff] %v1665_v39  ;;  %v1664_v42 = vadd.f32 %v2642_v58, %v908_v40  ;;  %v1666_v43 = vadd.f32 %v2644_v59, %v1101_v41 }
 0x146   : > { %v912_v44 = vpop.f32.mrf.mxu0  ;;  %v1105_v45 = vpop.f32.mrf.mxu1 }
 0x147   : > { %1792 = vst [vmem:[%s2648_s22 + $0xa8] sm:$0xff] %v1664_v42  ;;  %1794 = vst [vmem:[%s2648_s22 + $0xb8] sm:$0xff] %v1666_v43  ;;  %v1667_v46 = vadd.f32 %v2638_v56, %v912_v44  ;;  %v1669_v47 = vadd.f32 %v2640_v57, %v1105_v45 }
 0x148   : > { %v914_v48 = vpop.f32.mrf.mxu0  ;;  %v1107_v49 = vpop.f32.mrf.mxu1 }
 0x149   : > { %1795 = vst [vmem:[%s2648_s22 + $0xc0] sm:$0xff] %v1667_v46  ;;  %1797 = vst [vmem:[%s2648_s22 + $0xd0] sm:$0xff] %v1669_v47  ;;  %v1668_v50 = vadd.f32 %v2642_v58, %v914_v48  ;;  %v1670_v51 = vadd.f32 %v2644_v59, %v1107_v49 }
 0x14a   : > { %v916_v52 = vpop.f32.mrf.mxu0  ;;  %v1109_v53 = vpop.f32.mrf.mxu1 }
 0x14b   : > { %1796 = vst [vmem:[%s2648_s22 + $0xc8] sm:$0xff] %v1668_v50  ;;  %1798 = vst [vmem:[%s2648_s22 + $0xd8] sm:$0xff] %v1670_v51  ;;  %v1671_v54 = vadd.f32 %v2638_v56, %v916_v52  ;;  %v1673_v55 = vadd.f32 %v2640_v57, %v1109_v53 }
 0x14c   : > { %v918_v60 = vpop.f32.mrf.mxu0  ;;  %v1111_v61 = vpop.f32.mrf.mxu1 }
 0x14d   : > { %1799 = vst [vmem:[%s2648_s22 + $0xe0] sm:$0xff] %v1671_v54  ;;  %1801 = vst [vmem:[%s2648_s22 + $0xf0] sm:$0xff] %v1673_v55  ;;  %v1672_v62 = vadd.f32 %v2642_v58, %v918_v60  ;;  %v1674_v63 = vadd.f32 %v2644_v59, %v1111_v61 }
 0x14e   : > { %v922_v0 = vpop.f32.mrf.mxu0  ;;  %v1115_v1 = vpop.f32.mrf.mxu1 }
 0x14f   : > { %1800 = vst [vmem:[%s2648_s22 + $0xe8] sm:$0xff] %v1672_v62  ;;  %1802 = vst [vmem:[%s2648_s22 + $0xf8] sm:$0xff] %v1674_v63  ;;  %v1675_v2 = vadd.f32 %v2638_v56, %v922_v0  ;;  %v1677_v3 = vadd.f32 %v2640_v57, %v1115_v1 }
 0x150   : > { %v924_v4 = vpop.f32.mrf.mxu0  ;;  %v1117_v5 = vpop.f32.mrf.mxu1 }
 0x151   : > { %1803 = vst [vmem:[%s2648_s22 + $0x100] sm:$0xff] %v1675_v2  ;;  %1805 = vst [vmem:[%s2648_s22 + $0x110] sm:$0xff] %v1677_v3  ;;  %v1676_v6 = vadd.f32 %v2642_v58, %v924_v4  ;;  %v1678_v7 = vadd.f32 %v2644_v59, %v1117_v5 }
 0x152   : > { %v926_v8 = vpop.f32.mrf.mxu0  ;;  %v1119_v9 = vpop.f32.mrf.mxu1 }
 0x153   : > { %1804 = vst [vmem:[%s2648_s22 + $0x108] sm:$0xff] %v1676_v6  ;;  %1806 = vst [vmem:[%s2648_s22 + $0x118] sm:$0xff] %v1678_v7  ;;  %v1679_v10 = vadd.f32 %v2638_v56, %v926_v8  ;;  %v1681_v11 = vadd.f32 %v2640_v57, %v1119_v9 }
 0x154   : > { %v928_v12 = vpop.f32.mrf.mxu0  ;;  %v1121_v13 = vpop.f32.mrf.mxu1 }
 0x155   : > { %1807 = vst [vmem:[%s2648_s22 + $0x120] sm:$0xff] %v1679_v10  ;;  %1809 = vst [vmem:[%s2648_s22 + $0x130] sm:$0xff] %v1681_v11  ;;  %v1680_v14 = vadd.f32 %v2642_v58, %v928_v12  ;;  %v1682_v15 = vadd.f32 %v2644_v59, %v1121_v13 }
 0x156   : > { %v932_v16 = vpop.f32.mrf.mxu0  ;;  %v1125_v17 = vpop.f32.mrf.mxu1 }
 0x157   : > { %1808 = vst [vmem:[%s2648_s22 + $0x128] sm:$0xff] %v1680_v14  ;;  %1810 = vst [vmem:[%s2648_s22 + $0x138] sm:$0xff] %v1682_v15  ;;  %v1683_v18 = vadd.f32 %v2638_v56, %v932_v16  ;;  %v1685_v19 = vadd.f32 %v2640_v57, %v1125_v17 }
 0x158   : > { %v934_v20 = vpop.f32.mrf.mxu0  ;;  %v1127_v21 = vpop.f32.mrf.mxu1 }
 0x159   : > { %1811 = vst [vmem:[%s2648_s22 + $0x140] sm:$0xff] %v1683_v18  ;;  %1813 = vst [vmem:[%s2648_s22 + $0x150] sm:$0xff] %v1685_v19  ;;  %v1684_v22 = vadd.f32 %v2642_v58, %v934_v20  ;;  %v1686_v23 = vadd.f32 %v2644_v59, %v1127_v21 }
 0x15a   : > { %v936_v24 = vpop.f32.mrf.mxu0  ;;  %v1129_v25 = vpop.f32.mrf.mxu1 }
 0x15b   : > { %1812 = vst [vmem:[%s2648_s22 + $0x148] sm:$0xff] %v1684_v22  ;;  %1814 = vst [vmem:[%s2648_s22 + $0x158] sm:$0xff] %v1686_v23  ;;  %v1687_v26 = vadd.f32 %v2638_v56, %v936_v24  ;;  %v1689_v27 = vadd.f32 %v2640_v57, %v1129_v25 }
 0x15c   : > { %v938_v28 = vpop.f32.mrf.mxu0  ;;  %v1131_v29 = vpop.f32.mrf.mxu1 }
 0x15d   : > { %1815 = vst [vmem:[%s2648_s22 + $0x160] sm:$0xff] %v1687_v26  ;;  %1817 = vst [vmem:[%s2648_s22 + $0x170] sm:$0xff] %v1689_v27  ;;  %v1688_v30 = vadd.f32 %v2642_v58, %v938_v28  ;;  %v1690_v31 = vadd.f32 %v2644_v59, %v1131_v29 }
 0x15e   : > { %v942_v32 = vpop.f32.mrf.mxu0  ;;  %v1135_v33 = vpop.f32.mrf.mxu1 }
 0x15f   : > { %1816 = vst [vmem:[%s2648_s22 + $0x168] sm:$0xff] %v1688_v30  ;;  %1818 = vst [vmem:[%s2648_s22 + $0x178] sm:$0xff] %v1690_v31  ;;  %v1691_v34 = vadd.f32 %v2638_v56, %v942_v32  ;;  %v1693_v35 = vadd.f32 %v2640_v57, %v1135_v33 }
 0x160   : > { %v944_v36 = vpop.f32.mrf.mxu0  ;;  %v1137_v37 = vpop.f32.mrf.mxu1 }
 0x161   : > { %1819 = vst [vmem:[%s2648_s22 + $0x180] sm:$0xff] %v1691_v34  ;;  %1821 = vst [vmem:[%s2648_s22 + $0x190] sm:$0xff] %v1693_v35  ;;  %v1692_v38 = vadd.f32 %v2642_v58, %v944_v36  ;;  %v1694_v39 = vadd.f32 %v2644_v59, %v1137_v37 }
 0x162   : > { %v946_v40 = vpop.f32.mrf.mxu0  ;;  %v1139_v41 = vpop.f32.mrf.mxu1 }
 0x163   : > { %1820 = vst [vmem:[%s2648_s22 + $0x188] sm:$0xff] %v1692_v38  ;;  %1822 = vst [vmem:[%s2648_s22 + $0x198] sm:$0xff] %v1694_v39  ;;  %v1695_v42 = vadd.f32 %v2638_v56, %v946_v40  ;;  %v1697_v43 = vadd.f32 %v2640_v57, %v1139_v41 }
 0x164   : > { %v948_v44 = vpop.f32.mrf.mxu0  ;;  %v1141_v45 = vpop.f32.mrf.mxu1 }
 0x165   : > { %1823 = vst [vmem:[%s2648_s22 + $0x1a0] sm:$0xff] %v1695_v42  ;;  %1825 = vst [vmem:[%s2648_s22 + $0x1b0] sm:$0xff] %v1697_v43  ;;  %v1696_v46 = vadd.f32 %v2642_v58, %v948_v44  ;;  %v1698_v47 = vadd.f32 %v2644_v59, %v1141_v45 }
 0x166   : > { %v952_v48 = vpop.f32.mrf.mxu0  ;;  %v1145_v49 = vpop.f32.mrf.mxu1 }
 0x167   : > { %1824 = vst [vmem:[%s2648_s22 + $0x1a8] sm:$0xff] %v1696_v46  ;;  %1826 = vst [vmem:[%s2648_s22 + $0x1b8] sm:$0xff] %v1698_v47  ;;  %v1699_v50 = vadd.f32 %v2638_v56, %v952_v48  ;;  %v1701_v51 = vadd.f32 %v2640_v57, %v1145_v49 }
 0x168   : > { %v954_v52 = vpop.f32.mrf.mxu0  ;;  %v1147_v53 = vpop.f32.mrf.mxu1 }
 0x169   : > { %1827 = vst [vmem:[%s2648_s22 + $0x1c0] sm:$0xff] %v1699_v50  ;;  %1829 = vst [vmem:[%s2648_s22 + $0x1d0] sm:$0xff] %v1701_v51  ;;  %v1700_v54 = vadd.f32 %v2642_v58, %v954_v52  ;;  %v1702_v55 = vadd.f32 %v2644_v59, %v1147_v53 }
 0x16a   : > { %v956_v60 = vpop.f32.mrf.mxu0  ;;  %v1149_v61 = vpop.f32.mrf.mxu1 }
 0x16b   : > { %1828 = vst [vmem:[%s2648_s22 + $0x1c8] sm:$0xff] %v1700_v54  ;;  %1830 = vst [vmem:[%s2648_s22 + $0x1d8] sm:$0xff] %v1702_v55  ;;  %v1703_v62 = vadd.f32 %v2638_v56, %v956_v60  ;;  %v1705_v63 = vadd.f32 %v2640_v57, %v1149_v61 }
 0x16c   : > { %v958_v0 = vpop.f32.mrf.mxu0  ;;  %v1151_v1 = vpop.f32.mrf.mxu1 }
 0x16d   : > { %1831 = vst [vmem:[%s2648_s22 + $0x1e0] sm:$0xff] %v1703_v62  ;;  %1833 = vst [vmem:[%s2648_s22 + $0x1f0] sm:$0xff] %v1705_v63  ;;  %v1704_v2 = vadd.f32 %v2642_v58, %v958_v0  ;;  %v1706_v3 = vadd.f32 %v2644_v59, %v1151_v1 }
 0x16e   : > { %v962_v4 = vpop.f32.mrf.mxu0  ;;  %v1155_v5 = vpop.f32.mrf.mxu1 }
 0x16f   : > { %1832 = vst [vmem:[%s2648_s22 + $0x1e8] sm:$0xff] %v1704_v2  ;;  %1834 = vst [vmem:[%s2648_s22 + $0x1f8] sm:$0xff] %v1706_v3  ;;  %v1707_v6 = vadd.f32 %v2638_v56, %v962_v4  ;;  %v1709_v7 = vadd.f32 %v2640_v57, %v1155_v5 }
 0x170   : > { %v964_v8 = vpop.f32.mrf.mxu0  ;;  %v1157_v9 = vpop.f32.mrf.mxu1 }
 0x171   : > { %1835 = vst [vmem:[%s2648_s22 + $0x200] sm:$0xff] %v1707_v6  ;;  %1837 = vst [vmem:[%s2648_s22 + $0x210] sm:$0xff] %v1709_v7  ;;  %v1708_v10 = vadd.f32 %v2642_v58, %v964_v8  ;;  %v1710_v11 = vadd.f32 %v2644_v59, %v1157_v9 }
 0x172   : > { %v966_v12 = vpop.f32.mrf.mxu0  ;;  %v1159_v13 = vpop.f32.mrf.mxu1 }
 0x173   : > { %1836 = vst [vmem:[%s2648_s22 + $0x208] sm:$0xff] %v1708_v10  ;;  %1838 = vst [vmem:[%s2648_s22 + $0x218] sm:$0xff] %v1710_v11  ;;  %v1711_v14 = vadd.f32 %v2638_v56, %v966_v12  ;;  %v1713_v15 = vadd.f32 %v2640_v57, %v1159_v13 }
 0x174   : > { %v968_v16 = vpop.f32.mrf.mxu0  ;;  %v1161_v17 = vpop.f32.mrf.mxu1 }
 0x175   : > { %1839 = vst [vmem:[%s2648_s22 + $0x220] sm:$0xff] %v1711_v14  ;;  %1841 = vst [vmem:[%s2648_s22 + $0x230] sm:$0xff] %v1713_v15  ;;  %v1712_v18 = vadd.f32 %v2642_v58, %v968_v16  ;;  %v1714_v19 = vadd.f32 %v2644_v59, %v1161_v17 }
 0x176   : > { %v972_v20 = vpop.f32.mrf.mxu0  ;;  %v1165_v21 = vpop.f32.mrf.mxu1 }
 0x177   : > { %1840 = vst [vmem:[%s2648_s22 + $0x228] sm:$0xff] %v1712_v18  ;;  %1842 = vst [vmem:[%s2648_s22 + $0x238] sm:$0xff] %v1714_v19  ;;  %v1715_v22 = vadd.f32 %v2638_v56, %v972_v20  ;;  %v1717_v23 = vadd.f32 %v2640_v57, %v1165_v21 }
 0x178   : > { %v974_v24 = vpop.f32.mrf.mxu0  ;;  %v1167_v25 = vpop.f32.mrf.mxu1 }
 0x179   : > { %1843 = vst [vmem:[%s2648_s22 + $0x240] sm:$0xff] %v1715_v22  ;;  %1845 = vst [vmem:[%s2648_s22 + $0x250] sm:$0xff] %v1717_v23  ;;  %v1716_v26 = vadd.f32 %v2642_v58, %v974_v24  ;;  %v1718_v27 = vadd.f32 %v2644_v59, %v1167_v25 }
 0x17a   : > { %v976_v28 = vpop.f32.mrf.mxu0  ;;  %v1169_v29 = vpop.f32.mrf.mxu1 }
 0x17b   : > { %1844 = vst [vmem:[%s2648_s22 + $0x248] sm:$0xff] %v1716_v26  ;;  %1846 = vst [vmem:[%s2648_s22 + $0x258] sm:$0xff] %v1718_v27  ;;  %v1719_v30 = vadd.f32 %v2638_v56, %v976_v28  ;;  %v1721_v31 = vadd.f32 %v2640_v57, %v1169_v29 }
 0x17c   : > { %v978_v32 = vpop.f32.mrf.mxu0  ;;  %v1171_v33 = vpop.f32.mrf.mxu1 }
 0x17d   : > { %1847 = vst [vmem:[%s2648_s22 + $0x260] sm:$0xff] %v1719_v30  ;;  %1849 = vst [vmem:[%s2648_s22 + $0x270] sm:$0xff] %v1721_v31  ;;  %v1720_v34 = vadd.f32 %v2642_v58, %v978_v32  ;;  %v1722_v35 = vadd.f32 %v2644_v59, %v1171_v33 }
 0x17e   : > { %v982_v36 = vpop.f32.mrf.mxu0  ;;  %v1175_v37 = vpop.f32.mrf.mxu1 }
 0x17f   : > { %1848 = vst [vmem:[%s2648_s22 + $0x268] sm:$0xff] %v1720_v34  ;;  %1850 = vst [vmem:[%s2648_s22 + $0x278] sm:$0xff] %v1722_v35  ;;  %v1723_v38 = vadd.f32 %v2638_v56, %v982_v36  ;;  %v1725_v39 = vadd.f32 %v2640_v57, %v1175_v37 }
 0x180   : > { %v984_v40 = vpop.f32.mrf.mxu0  ;;  %v1177_v41 = vpop.f32.mrf.mxu1 }
 0x181   : > { %1851 = vst [vmem:[%s2648_s22 + $0x280] sm:$0xff] %v1723_v38  ;;  %1853 = vst [vmem:[%s2648_s22 + $0x290] sm:$0xff] %v1725_v39  ;;  %v1724_v42 = vadd.f32 %v2642_v58, %v984_v40  ;;  %v1726_v43 = vadd.f32 %v2644_v59, %v1177_v41 }
 0x182   : > { %v986_v44 = vpop.f32.mrf.mxu0  ;;  %v1179_v45 = vpop.f32.mrf.mxu1 }
 0x183   : > { %1852 = vst [vmem:[%s2648_s22 + $0x288] sm:$0xff] %v1724_v42  ;;  %1854 = vst [vmem:[%s2648_s22 + $0x298] sm:$0xff] %v1726_v43  ;;  %v1727_v46 = vadd.f32 %v2638_v56, %v986_v44  ;;  %v1729_v47 = vadd.f32 %v2640_v57, %v1179_v45 }
 0x184   : > { %v988_v48 = vpop.f32.mrf.mxu0  ;;  %v1181_v49 = vpop.f32.mrf.mxu1 }
 0x185   : > { %1855 = vst [vmem:[%s2648_s22 + $0x2a0] sm:$0xff] %v1727_v46  ;;  %1857 = vst [vmem:[%s2648_s22 + $0x2b0] sm:$0xff] %v1729_v47  ;;  %v1728_v50 = vadd.f32 %v2642_v58, %v988_v48  ;;  %v1730_v51 = vadd.f32 %v2644_v59, %v1181_v49 }
 0x186   : > { %v992_v52 = vpop.f32.mrf.mxu0  ;;  %v1185_v53 = vpop.f32.mrf.mxu1 }
 0x187   : > { %1856 = vst [vmem:[%s2648_s22 + $0x2a8] sm:$0xff] %v1728_v50  ;;  %1858 = vst [vmem:[%s2648_s22 + $0x2b8] sm:$0xff] %v1730_v51  ;;  %v1731_v54 = vadd.f32 %v2638_v56, %v992_v52  ;;  %v1733_v55 = vadd.f32 %v2640_v57, %v1185_v53 }
 0x188   : > { %v994_v60 = vpop.f32.mrf.mxu0  ;;  %v1187_v61 = vpop.f32.mrf.mxu1 }
 0x189   : > { %1859 = vst [vmem:[%s2648_s22 + $0x2c0] sm:$0xff] %v1731_v54  ;;  %1861 = vst [vmem:[%s2648_s22 + $0x2d0] sm:$0xff] %v1733_v55  ;;  %v1732_v62 = vadd.f32 %v2642_v58, %v994_v60  ;;  %v1734_v63 = vadd.f32 %v2644_v59, %v1187_v61 }
 0x18a   : > { %v996_v0 = vpop.f32.mrf.mxu0  ;;  %v1189_v1 = vpop.f32.mrf.mxu1 }
 0x18b   : > { %1860 = vst [vmem:[%s2648_s22 + $0x2c8] sm:$0xff] %v1732_v62  ;;  %1862 = vst [vmem:[%s2648_s22 + $0x2d8] sm:$0xff] %v1734_v63  ;;  %v1735_v2 = vadd.f32 %v2638_v56, %v996_v0  ;;  %v1737_v3 = vadd.f32 %v2640_v57, %v1189_v1 }
 0x18c   : > { %v998_v4 = vpop.f32.mrf.mxu0  ;;  %v1191_v5 = vpop.f32.mrf.mxu1 }
 0x18d   : > { %1863 = vst [vmem:[%s2648_s22 + $0x2e0] sm:$0xff] %v1735_v2  ;;  %1865 = vst [vmem:[%s2648_s22 + $0x2f0] sm:$0xff] %v1737_v3  ;;  %v1736_v6 = vadd.f32 %v2642_v58, %v998_v4  ;;  %v1738_v7 = vadd.f32 %v2644_v59, %v1191_v5 }
 0x18e   : > { %v1002_v8 = vpop.f32.mrf.mxu0  ;;  %v1195_v9 = vpop.f32.mrf.mxu1 }
 0x18f   : > { %1864 = vst [vmem:[%s2648_s22 + $0x2e8] sm:$0xff] %v1736_v6  ;;  %1866 = vst [vmem:[%s2648_s22 + $0x2f8] sm:$0xff] %v1738_v7  ;;  %v1739_v10 = vadd.f32 %v2638_v56, %v1002_v8  ;;  %v1741_v11 = vadd.f32 %v2640_v57, %v1195_v9 }
 0x190   : > { %v1004_v12 = vpop.f32.mrf.mxu0  ;;  %v1197_v13 = vpop.f32.mrf.mxu1 }
 0x191   : > { %1867 = vst [vmem:[%s2648_s22 + $0x300] sm:$0xff] %v1739_v10  ;;  %1869 = vst [vmem:[%s2648_s22 + $0x310] sm:$0xff] %v1741_v11  ;;  %v1740_v14 = vadd.f32 %v2642_v58, %v1004_v12  ;;  %v1742_v15 = vadd.f32 %v2644_v59, %v1197_v13 }
 0x192   : > { %v1006_v16 = vpop.f32.mrf.mxu0  ;;  %v1199_v17 = vpop.f32.mrf.mxu1 }
 0x193   : > { %1868 = vst [vmem:[%s2648_s22 + $0x308] sm:$0xff] %v1740_v14  ;;  %1870 = vst [vmem:[%s2648_s22 + $0x318] sm:$0xff] %v1742_v15  ;;  %v1743_v18 = vadd.f32 %v2638_v56, %v1006_v16  ;;  %v1745_v19 = vadd.f32 %v2640_v57, %v1199_v17 }
 0x194   : > { %v1008_v20 = vpop.f32.mrf.mxu0  ;;  %v1201_v21 = vpop.f32.mrf.mxu1 }
 0x195   : > { %1871 = vst [vmem:[%s2648_s22 + $0x320] sm:$0xff] %v1743_v18  ;;  %1873 = vst [vmem:[%s2648_s22 + $0x330] sm:$0xff] %v1745_v19  ;;  %v1744_v22 = vadd.f32 %v2642_v58, %v1008_v20  ;;  %v1746_v23 = vadd.f32 %v2644_v59, %v1201_v21 }
 0x196   : > { %v1012_v24 = vpop.f32.mrf.mxu0  ;;  %v1205_v25 = vpop.f32.mrf.mxu1 }
 0x197   : > { %1872 = vst [vmem:[%s2648_s22 + $0x328] sm:$0xff] %v1744_v22  ;;  %1874 = vst [vmem:[%s2648_s22 + $0x338] sm:$0xff] %v1746_v23  ;;  %v1747_v26 = vadd.f32 %v2638_v56, %v1012_v24  ;;  %v1749_v27 = vadd.f32 %v2640_v57, %v1205_v25 }
 0x198   : > { %v1014_v28 = vpop.f32.mrf.mxu0  ;;  %v1207_v29 = vpop.f32.mrf.mxu1 }
 0x199   : > { %1875 = vst [vmem:[%s2648_s22 + $0x340] sm:$0xff] %v1747_v26  ;;  %1877 = vst [vmem:[%s2648_s22 + $0x350] sm:$0xff] %v1749_v27  ;;  %v1748_v30 = vadd.f32 %v2642_v58, %v1014_v28  ;;  %v1750_v31 = vadd.f32 %v2644_v59, %v1207_v29 }
 0x19a   : > { %v1016_v32 = vpop.f32.mrf.mxu0  ;;  %v1209_v33 = vpop.f32.mrf.mxu1 }
 0x19b   : > { %1876 = vst [vmem:[%s2648_s22 + $0x348] sm:$0xff] %v1748_v30  ;;  %1878 = vst [vmem:[%s2648_s22 + $0x358] sm:$0xff] %v1750_v31  ;;  %v1751_v34 = vadd.f32 %v2638_v56, %v1016_v32  ;;  %v1753_v35 = vadd.f32 %v2640_v57, %v1209_v33 }
 0x19c   : > { %v1018_v36 = vpop.f32.mrf.mxu0  ;;  %v1211_v37 = vpop.f32.mrf.mxu1 }
 0x19d   : > { %1879 = vst [vmem:[%s2648_s22 + $0x360] sm:$0xff] %v1751_v34  ;;  %1881 = vst [vmem:[%s2648_s22 + $0x370] sm:$0xff] %v1753_v35  ;;  %v1752_v38 = vadd.f32 %v2642_v58, %v1018_v36  ;;  %v1754_v39 = vadd.f32 %v2644_v59, %v1211_v37 }
 0x19e   : > { %v1022_v40 = vpop.f32.mrf.mxu0  ;;  %v1215_v41 = vpop.f32.mrf.mxu1 }
 0x19f   : > { %1880 = vst [vmem:[%s2648_s22 + $0x368] sm:$0xff] %v1752_v38  ;;  %1882 = vst [vmem:[%s2648_s22 + $0x378] sm:$0xff] %v1754_v39  ;;  %v1755_v42 = vadd.f32 %v2638_v56, %v1022_v40  ;;  %v1757_v43 = vadd.f32 %v2640_v57, %v1215_v41 }
 0x1a0   : > { %v1024_v44 = vpop.f32.mrf.mxu0  ;;  %v1217_v45 = vpop.f32.mrf.mxu1 }
 0x1a1   : > { %1883 = vst [vmem:[%s2648_s22 + $0x380] sm:$0xff] %v1755_v42  ;;  %1885 = vst [vmem:[%s2648_s22 + $0x390] sm:$0xff] %v1757_v43  ;;  %v1756_v46 = vadd.f32 %v2642_v58, %v1024_v44  ;;  %v1758_v47 = vadd.f32 %v2644_v59, %v1217_v45 }
 0x1a2   : > { %v1026_v48 = vpop.f32.mrf.mxu0  ;;  %v1219_v49 = vpop.f32.mrf.mxu1 }
 0x1a3   : > { %1884 = vst [vmem:[%s2648_s22 + $0x388] sm:$0xff] %v1756_v46  ;;  %1886 = vst [vmem:[%s2648_s22 + $0x398] sm:$0xff] %v1758_v47  ;;  %v1759_v50 = vadd.f32 %v2638_v56, %v1026_v48  ;;  %v1761_v51 = vadd.f32 %v2640_v57, %v1219_v49 }
 0x1a4   : > { %v1028_v52 = vpop.f32.mrf.mxu0  ;;  %v1221_v53 = vpop.f32.mrf.mxu1 }
 0x1a5   : > { %1887 = vst [vmem:[%s2648_s22 + $0x3a0] sm:$0xff] %v1759_v50  ;;  %1889 = vst [vmem:[%s2648_s22 + $0x3b0] sm:$0xff] %v1761_v51  ;;  %v1760_v54 = vadd.f32 %v2642_v58, %v1028_v52  ;;  %v1762_v55 = vadd.f32 %v2644_v59, %v1221_v53 }
 0x1a6   : > { %v1032_v60 = vpop.f32.mrf.mxu0  ;;  %v1225_v61 = vpop.f32.mrf.mxu1 }
 0x1a7   : > { %1888 = vst [vmem:[%s2648_s22 + $0x3a8] sm:$0xff] %v1760_v54  ;;  %1890 = vst [vmem:[%s2648_s22 + $0x3b8] sm:$0xff] %v1762_v55  ;;  %v1763_v62 = vadd.f32 %v2638_v56, %v1032_v60  ;;  %v1765_v63 = vadd.f32 %v2640_v57, %v1225_v61 }
 0x1a8   : > { %v1034_v0 = vpop.f32.mrf.mxu0  ;;  %v1227_v1 = vpop.f32.mrf.mxu1 }
 0x1a9   : > { %1891 = vst [vmem:[%s2648_s22 + $0x3c0] sm:$0xff] %v1763_v62  ;;  %1893 = vst [vmem:[%s2648_s22 + $0x3d0] sm:$0xff] %v1765_v63  ;;  %v1764_v2 = vadd.f32 %v2642_v58, %v1034_v0  ;;  %v1766_v3 = vadd.f32 %v2644_v59, %v1227_v1 }
 0x1aa   : > { %v1036_v4 = vpop.f32.mrf.mxu0  ;;  %v1229_v5 = vpop.f32.mrf.mxu1 }
 0x1ab   : > { %1892 = vst [vmem:[%s2648_s22 + $0x3c8] sm:$0xff] %v1764_v2  ;;  %1894 = vst [vmem:[%s2648_s22 + $0x3d8] sm:$0xff] %v1766_v3  ;;  %v1767_v6 = vadd.f32 %v2638_v56, %v1036_v4  ;;  %v1769_v7 = vadd.f32 %v2640_v57, %v1229_v5 }
 0x1ac   : > { %v1038_v8 = vpop.f32.mrf.mxu0  ;;  %v1231_v9 = vpop.f32.mrf.mxu1 }
 0x1ad   : > { %1895 = vst [vmem:[%s2648_s22 + $0x3e0] sm:$0xff] %v1767_v6  ;;  %1897 = vst [vmem:[%s2648_s22 + $0x3f0] sm:$0xff] %v1769_v7  ;;  %v1768_v10 = vadd.f32 %v2642_v58, %v1038_v8  ;;  %v1770_v56 = vadd.f32 %v2644_v59, %v1231_v9 }
 0x1af   : > { %1896 = vst [vmem:[%s2648_s22 + $0x3e8] sm:$0xff] %v1768_v10  ;;  %1898 = vst [vmem:[%s2648_s22 + $0x3f8] sm:$0xff] %v1770_v56 }
 0x1b0   : > { %2349 = shalt.err (!%p2346_p5)
}
 0x1b1   : > { %s2350_s27 = scalar_lea.hbm %s2903_s8, 16384  ;;  %s2354_s4 = scalar_lea.hbm %s2962_s3, 32768 }
 0x1b2   : > { %p2351_p10 = scmp.ne.s32.totalorder %s2903_s8, %s2350_s27  ;;  %p2355_p6 = scmp.lt.s32.totalorder %s2903_s8, %s2962_s3 }
 0x1b3   : > { %p2356_p12 = scmp.lt.s32.totalorder %s2354_s4, %s2350_s27 }
 0x1b4   : > { %p2352_p1 = pnand %p2351_p10, %p2548_p7 }
 0x1b5   : > { %p2357_p3 = por %p2356_p12, %p2355_p6 }
 0x1b6   : > { %p2353_p4 = pneg %p2352_p1 }
 0x1b8   : > { %p2358_p8 = pnand %p2357_p3, %p2353_p4 }
 0x1ba   : > { %2361 = shalt.err (!%p2358_p8)
}
 0x1bb   : > { %s2431_s22 = smov 512   ;;  %s2432_s24 = smov 32  }
 0x1bc   : > { %2112 = dma.vmem_to_hbm [thread:$0]  (%p2548_p7), %s2905_s5, 16384, %s2903_s8, %s1900_s15, %s2431_s22, %s2431_s22, %s2432_s24  }
 0x1bd PF: > { %s1931_s7 = sand.u32 1, %s2400_s12   ;;  %p2976_p9 = scmp.ne.s32.totalorder %s2969_s23, 0 }
 0x1be   : > { %p2977_p11 = scmp.ge.s32.totalorder %s2420_s17, 2  ;;  %s1932_s21 = scalar_lea.sflag [#allocation5], %s1931_s7 }
 0x1c0   : > { %p2126_p2 = pnand %p2977_p11, %p2976_p9 }
 0x1c2   : > { %p2127_p13 = pneg %p2126_p2 }
 0x1c4   : > { %2395 = dma.done.wait (%p2127_p13), %s1932_s21, 16384  }
 0x1c5   : > { %2397 = vsyncadd (%p2127_p13), %s1932_s21, 4294950912  ;;  %s20_s17 = sadd.s32 1, %s2420_s17   ;;  %s2978_s12 = smov %s2404_s13 }
 0x1c6   : > { %p17_p0 = scmp.ge.s32.totalorder %s20_s17, 4   ;;  %s2979_s13 = smov %s2408_s14 }
 0x1c7   : > { %s2980_s14 = smov %s2557_s29  ;;  %s2981_s15 = smov %s2416_s16 }
 0x1c8   : > { %s2982_s16 = smov %s2984_s11  ;;  %19 = sbr.rel (!%p17_p0) target bundleno = 7 (0x7), region = 95 }
 0x1cd   :  { %1937 = vsyncpa [#allocation4], 1 }
 0x1ce   :  { %1939 = vsyncpa [#allocation4 + $0x1], 1 }
 0x1cf   :  { %1940 = vsyncpa [#allocation7], 1 }
 0x1d0   :  { %1941 = vsyncpa [#allocation5], 1 }
 0x1d1   :  { %1943 = vsyncpa [#allocation5 + $0x1], 1 }

</bundles_post_ra>
